<compile_context>
chip_gen: v7x
topology: tpu7x:2x2x1
jax: 0.10.0
libtpu: 0.0.40
codegen_flags: <defaults>
</compile_context>

<pallas_src>
import functools

import jax
import jax.numpy as jnp
from jax.experimental import pallas as pl
from jax.experimental.pallas import tpu as pltpu

EPS = 1e-5
IN_F = 300                 # fc1 in_features
OUT_F = 4                  # fc3 out_features
H1 = 128                   # fc1 out_features (100) zero-padded to a full lane width
H2 = 128                   # fc2 out_features (30) zero-padded
OUT_P = 128                # fc3 out_features (4) zero-padded -> unmasked lane-dense stores
MM_DTYPE = jnp.bfloat16    # MXU operand dtype (accumulation stays f32)
ACT_DTYPE = jnp.bfloat16   # whole-batch activation-scratch storage dtype (halves VMEM vs f32)

# Row layout of the packed (8, 128) bias/gamma/beta slab (row 7 is zero padding).
ROW_B1, ROW_G1, ROW_BE1, ROW_B2, ROW_G2, ROW_BE2, ROW_B3 = range(7)


def _prelu(x, a):
    # PReLU with a single shared slope (PyTorch nn.PReLU() default).
    return jnp.where(x >= 0, x, a * x)


def _pick_tile(b):
    """Largest batch tile that divides B and is a multiple of 8 (else whole batch)."""
    for t in (2048, 1024, 512, 256, 128, 64, 32, 16, 8):
        if b % t == 0:
            return t
    return b


def _vmem_capacity_bytes():
    """Physical VMEM of this chip generation (fallback: v7x's 64 MiB per TC)."""
    try:
        return int(pltpu.get_tpu_info().vmem_capacity_bytes)
    except Exception:  # noqa: BLE001 - conservative fallback if query unavailable
        return 64 * 2 ** 20


def _kernel(x_ref, w1_ref, w2_ref, w3_ref, vec_ref, a_ref,
            o_ref,
            h1_buf, h2_buf, s1_buf, s2_buf,
            *, tb, inv_b):
    phase = pl.program_id(0)
    i = pl.program_id(1)
    row0 = pl.multiple_of(i * tb, tb)

    @pl.when(jnp.logical_and(phase == 0, i == 0))
    def _init():
        s1_buf[...] = jnp.zeros_like(s1_buf)
        s2_buf[...] = jnp.zeros_like(s2_buf)

    def accumulate(h, s_buf):
        # One-pass stats (sum & sum-of-squares), fused into a single full-ref RMW.
        # NOTE: var = E[h^2] - E[h]^2 can lose precision if |mean| >> std at huge B;
        # acceptable here (post-PReLU activations have modest means), clamped >= 0 below.
        upd = jnp.concatenate(
            [jnp.sum(h, axis=0, keepdims=True),
             jnp.sum(h * h, axis=0, keepdims=True)], axis=0)
        s_buf[...] = s_buf[...] + upd

    def bn_apply(h, s_buf, g, be):
        st = s_buf[...]
        mu = st[0:1, :] * inv_b
        var = jnp.maximum(st[1:2, :] * inv_b - mu * mu, 0.0)
        return (h - mu) * (jax.lax.rsqrt(var + EPS) * g) + be

    @pl.when(phase == 0)
    def _p0():
        h = jnp.dot(x_ref[...].astype(MM_DTYPE), w1_ref[...],
                    preferred_element_type=jnp.float32) + vec_ref[ROW_B1:ROW_B1 + 1, :]
        h = _prelu(h, a_ref[0])
        h1_buf[pl.ds(row0, tb), :] = h.astype(ACT_DTYPE)
        accumulate(h, s1_buf)

    @pl.when(phase == 1)
    def _p1():
        h1 = h1_buf[pl.ds(row0, tb), :].astype(jnp.float32)
        h1 = bn_apply(h1, s1_buf,
                      vec_ref[ROW_G1:ROW_G1 + 1, :], vec_ref[ROW_BE1:ROW_BE1 + 1, :])
        h = jnp.dot(h1.astype(MM_DTYPE), w2_ref[...],
                    preferred_element_type=jnp.float32) + vec_ref[ROW_B2:ROW_B2 + 1, :]
        h = _prelu(h, a_ref[1])
        h2_buf[pl.ds(row0, tb), :] = h.astype(ACT_DTYPE)
        accumulate(h, s2_buf)

    @pl.when(phase == 2)
    def _p2():
        h2 = h2_buf[pl.ds(row0, tb), :].astype(jnp.float32)
        h2 = bn_apply(h2, s2_buf,
                      vec_ref[ROW_G2:ROW_G2 + 1, :], vec_ref[ROW_BE2:ROW_BE2 + 1, :])
        out = jnp.dot(h2.astype(MM_DTYPE), w3_ref[...],
                      preferred_element_type=jnp.float32) + vec_ref[ROW_B3:ROW_B3 + 1, :]
        o_ref[...] = out.astype(o_ref.dtype)


def net_forward(x, kp):
    """x: (B, 300) f32 (or bf16). kp: packed/padded params from pack_params(). Returns (B, 4) f32."""
    B, f = x.shape
    assert f == IN_F, f"expected {IN_F} input features, got {f}"
    TB = _pick_tile(B)
    NT = B // TB
    inv_b = 1.0 / float(B)
    last_blk = NT - 1

    x_itemsize = jnp.dtype(x.dtype).itemsize
    act_itemsize = jnp.dtype(ACT_DTYPE).itemsize
    mm_itemsize = jnp.dtype(MM_DTYPE).itemsize
    weight_bytes = (IN_F * H1 + H1 * H2 + H2 * OUT_P) * mm_itemsize

    # --- VMEM budgeting (explicit check; BN needs full-batch stats so we never chunk silently) ---
    vmem_needed = (
        B * (H1 + H2) * act_itemsize        # whole-batch activation scratch (bf16)
        + 2 * weight_bytes                  # resident weights (default double-buffered)
        + 2 * TB * IN_F * x_itemsize        # double-buffered x tiles
        + 2 * TB * OUT_P * 4                # double-buffered out tiles
        + 2 * 8 * OUT_P * 4                 # packed bias/gamma/beta slab
        + (2 << 20)                         # slack for stats scratch / compiler scratch
    )
    vmem_cap = int(0.85 * _vmem_capacity_bytes())   # ~54 MiB on v7x, ~108 MiB on v5e/v6e
    if vmem_needed > vmem_cap:
        raise ValueError(
            f"batch {B} needs ~{vmem_needed >> 20} MiB of VMEM (> ~{vmem_cap >> 20} MiB on this "
            "chip); BatchNorm requires full-batch statistics, so shard the batch across "
            "devices / separate BN groups rather than chunking inside one call.")
    vmem_limit = int(min(vmem_cap, max(vmem_needed, 32 * 2 ** 20)))

    kernel = functools.partial(_kernel, tb=TB, inv_b=inv_b)

    resident = lambda p, i: (0, 0)                               # weights/slab: fetched once
    x_map = lambda p, i: (jnp.where(p == 0, i, last_blk), 0)     # no refetch after phase 0
    out_map = lambda p, i: (jnp.where(p == 2, i, 0), 0)          # out blocks advance in phase 2

    in_specs = [
        pl.BlockSpec((TB, IN_F), x_map),
        pl.BlockSpec((IN_F, H1), resident),
        pl.BlockSpec((H1, H2), resident),
        pl.BlockSpec((H2, OUT_P), resident),
        pl.BlockSpec((8, OUT_P), resident),                      # packed b/gamma/beta slab
        pl.BlockSpec(memory_space=pltpu.MemorySpace.SMEM),       # PReLU slopes (2,) scalar path
    ]
    out_specs = pl.BlockSpec((TB, OUT_P), out_map)

    scratch_shapes = [
        pltpu.VMEM((B, H1), ACT_DTYPE),      # h1 activations (whole batch, bf16)
        pltpu.VMEM((B, H2), ACT_DTYPE),      # h2 activations (whole batch, bf16)
        pltpu.VMEM((2, H1), jnp.float32),    # BN1 [sum; sum_sq]
        pltpu.VMEM((2, H2), jnp.float32),    # BN2 [sum; sum_sq]
    ]

    grid_spec = pltpu.PrefetchScalarGridSpec(
        num_scalar_prefetch=0,
        grid=(3, NT),
        in_specs=in_specs,
        out_specs=out_specs,
        scratch_shapes=scratch_shapes,
    )

    flops = 2 * B * (IN_F * H1 + H1 * H2 + H2 * OUT_P)
    bytes_accessed = (B * IN_F * x_itemsize + B * OUT_P * 4
                      + weight_bytes + 8 * OUT_P * 4 + 2 * 4)
    cost = pl.CostEstimate(flops=flops,
                           transcendentals=NT * (H1 + H2),
                           bytes_accessed=bytes_accessed)

    out_padded = pl.pallas_call(
        kernel,
        out_shape=jax.ShapeDtypeStruct((B, OUT_P), jnp.float32),
        grid_spec=grid_spec,
        compiler_params=pltpu.CompilerParams(
            # Both axes sequential on one TC: phases depend on each other and BN stats
            # accumulate across batch tiles into shared scratch.
            dimension_semantics=("arbitrary", "arbitrary"),
            vmem_limit_bytes=vmem_limit,
        ),
        cost_estimate=cost,
    )(
        x,
        kp["w1"], kp["w2"], kp["w3"],
        kp["vecs"], kp["a"],
    )
    return out_padded[:, :OUT_F]


def init_params(key):
    """Deterministic synthetic init matching the PyTorch module's shapes ((in,out) layout)."""
    ks = jax.random.split(key, 3)

    def linear(k, fan_in, fan_out):
        kw, kb = jax.random.split(k)
        bound = 1.0 / jnp.sqrt(fan_in)
        w = jax.random.uniform(kw, (fan_in, fan_out), jnp.float32, -bound, bound)
        b = jax.random.uniform(kb, (1, fan_out), jnp.float32, -bound, bound)
        return w, b

    w1, b1 = linear(ks[0], 300, 100)
    w2, b2 = linear(ks[1], 100, 30)
    w3, b3 = linear(ks[2], 30, 4)
    return {
        "w1": w1, "b1": b1,
        "a1": jnp.full((1, 1), 0.25, jnp.float32),   # PReLU init
        "g1": jnp.ones((1, 100), jnp.float32),       # BN1 gamma
        "be1": jnp.zeros((1, 100), jnp.float32),     # BN1 beta
        "w2": w2, "b2": b2,
        "a2": jnp.full((1, 1), 0.25, jnp.float32),
        "g2": jnp.ones((1, 30), jnp.float32),
        "be2": jnp.zeros((1, 30), jnp.float32),
        "w3": w3, "b3": b3,
    }


def pack_params(p):
    """Zero-pad to lane-dense 128-wide tiles; weights -> bf16; vectors packed into one (8,128) slab.

    gamma/beta/bias padding is zero so padded lanes stay exactly zero through PReLU/BN.
    """
    def pad2(a, rows, cols):
        z = jnp.zeros((rows, cols), jnp.float32)
        return z.at[: a.shape[0], : a.shape[1]].set(a)

    def pad_row(a, cols):
        z = jnp.zeros((cols,), jnp.float32)
        return z.at[: a.shape[-1]].set(a.reshape(-1))

    vecs = jnp.stack([
        pad_row(p["b1"], H1), pad_row(p["g1"], H1), pad_row(p["be1"], H1),
        pad_row(p["b2"], H2), pad_row(p["g2"], H2), pad_row(p["be2"], H2),
        pad_row(p["b3"], OUT_P), jnp.zeros((OUT_P,), jnp.float32),
    ])  # (8, 128)

    return {
        "w1": pad2(p["w1"], IN_F, H1).astype(MM_DTYPE),
        "w2": pad2(p["w2"], H1, H2).astype(MM_DTYPE),
        "w3": pad2(p["w3"], H2, OUT_P).astype(MM_DTYPE),
        "vecs": vecs,
        "a": jnp.stack([p["a1"].reshape(()), p["a2"].reshape(())]).astype(jnp.float32),
    }


def net_forward_ref(x, p, mm_dtype=jnp.float32, act_dtype=jnp.float32):
    """Pure-JAX reference. mm_dtype/act_dtype = MM_DTYPE/ACT_DTYPE mirrors the kernel numerics;
    leaving them f32 gives the original module's numerics."""
    def mm(a, w):
        return jnp.dot(a.astype(mm_dtype), w.astype(mm_dtype),
                       preferred_element_type=jnp.float32)

    def bn(h, g, be):
        # Batch stats from the pre-storage (f32) activation; BN applied to the storage-rounded
        # activation (mirrors the kernel's bf16 whole-batch VMEM scratch).
        mu = jnp.mean(h, axis=0, keepdims=True)
        var = jnp.mean((h - mu) * (h - mu), axis=0, keepdims=True)
        hq = h.astype(act_dtype).astype(jnp.float32)
        return (hq - mu) * jax.lax.rsqrt(var + EPS) * g + be

    h = _prelu(mm(x, p["w1"]) + p["b1"], p["a1"][0, 0])
    h = bn(h, p["g1"], p["be1"])
    h = _prelu(mm(h, p["w2"]) + p["b2"], p["a2"][0, 0])
    h = bn(h, p["g2"], p["be2"])
    return mm(h, p["w3"]) + p["b3"]


if __name__ == "__main__":
    key = jax.random.PRNGKey(0)
    kparam, kx = jax.random.split(key)
    params = init_params(kparam)
    packed = pack_params(params)

    # B=48 -> TB=16, NT=3: exercises cross-tile BN-stat accumulation and the phase-boundary
    # index-map paths.  B=256 -> TB=256, NT=1: single-tile path.
    for B in (48, 256):
        x = jax.random.normal(jax.random.fold_in(kx, B), (B, IN_F), jnp.float32)

        out = jax.block_until_ready(net_forward(x, packed))
        assert out.shape == (B, OUT_F)

        # Strict check against a reference mirroring the kernel's numerics
        # (bf16 MXU operands, f32 accumulate, bf16 activation storage).
        ref_mirror = net_forward_ref(x, params, mm_dtype=MM_DTYPE, act_dtype=ACT_DTYPE)
        assert jnp.allclose(out, ref_mirror, atol=5e-3, rtol=5e-3), \
            f"B={B}: mismatch vs bf16-mirrored reference"

        # Loose sanity check against the full-f32 reference (original module numerics).
        ref_f32 = net_forward_ref(x, params)
        assert jnp.allclose(out, ref_f32, atol=1e-1, rtol=5e-2), \
            f"B={B}: mismatch vs f32 reference"

    print("KERNEL_OK")
</pallas_src>

<mosaic_0001>
module attributes {stable_mosaic.version = 11 : i64} {
  func.func @_kernel(%arg0: i32, %arg1: i32, %arg2: memref<16x300xf32, #tpu.memory_space<vmem>>, %arg3: memref<300x128xbf16, #tpu.memory_space<vmem>>, %arg4: memref<128x128xbf16, #tpu.memory_space<vmem>>, %arg5: memref<128x128xbf16, #tpu.memory_space<vmem>>, %arg6: memref<8x128xf32, #tpu.memory_space<vmem>>, %arg7: memref<2xf32, #tpu.memory_space<smem>>, %arg8: memref<16x128xf32, #tpu.memory_space<vmem>>, %arg9: memref<48x128xbf16, #tpu.memory_space<vmem>>, %arg10: memref<48x128xbf16, #tpu.memory_space<vmem>>, %arg11: memref<2x128xf32, #tpu.memory_space<vmem>>, %arg12: memref<2x128xf32, #tpu.memory_space<vmem>>) attributes {dimension_semantics = [#tpu.dimension_semantics<arbitrary>, #tpu.dimension_semantics<arbitrary>], iteration_bounds = array<i64: 3, 3>, scalar_prefetch = 0 : i64, scratch_operands = 4 : i64, tpu.core_type = #tpu.core_type<tc>, window_params = [{transform_indices = @transform_0, window_bounds = array<i64: 16, 300>}, {pipeline_mode = #tpu.pipeline_mode<synchronous>, transform_indices = @transform_1, window_bounds = array<i64: 300, 128>}, {pipeline_mode = #tpu.pipeline_mode<synchronous>, transform_indices = @transform_2, window_bounds = array<i64: 128, 128>}, {pipeline_mode = #tpu.pipeline_mode<synchronous>, transform_indices = @transform_3, window_bounds = array<i64: 128, 128>}, {pipeline_mode = #tpu.pipeline_mode<synchronous>, transform_indices = @transform_4, window_bounds = array<i64: 8, 128>}, {transform_indices = @transform_5, window_bounds = array<i64: 2>}, {transform_indices = @transform_6, window_bounds = array<i64: 16, 128>}]} {
    %c16_i32 = arith.constant 16 : i32
    %0 = arith.muli %arg1, %c16_i32 : i32
    %1 = tpu.assume_multiple %0, 16 : i32
    %c0_i32 = arith.constant 0 : i32
    %2 = arith.cmpi eq, %arg0, %c0_i32 : i32
    %c0_i32_0 = arith.constant 0 : i32
    %3 = arith.cmpi eq, %arg1, %c0_i32_0 : i32
    %4 = arith.andi %2, %3 : i1
    %5 = arith.extui %4 : i1 to i32
    %c0_i32_1 = arith.constant 0 : i32
    %6 = arith.cmpi ne, %5, %c0_i32_1 : i32
    scf.if %6 {
      %cst = arith.constant 0.000000e+00 : f32
      %16 = vector.broadcast %cst : f32 to vector<2x128xf32>
      %c0 = arith.constant 0 : index
      %c0_6 = arith.constant 0 : index
      %17 = vector.load %arg11[%c0, %c0_6] : memref<2x128xf32, #tpu.memory_space<vmem>>, vector<2x128xf32>
      tpu.vector_store %arg11[%c0, %c0_6], %16 {strides = array<i32>} : memref<2x128xf32, #tpu.memory_space<vmem>>, vector<2x128xf32>,
      %cst_7 = arith.constant 0.000000e+00 : f32
      %18 = vector.broadcast %cst_7 : f32 to vector<2x128xf32>
      %c0_8 = arith.constant 0 : index
      %c0_9 = arith.constant 0 : index
      %19 = vector.load %arg12[%c0_8, %c0_9] : memref<2x128xf32, #tpu.memory_space<vmem>>, vector<2x128xf32>
      tpu.vector_store %arg12[%c0_8, %c0_9], %18 {strides = array<i32>} : memref<2x128xf32, #tpu.memory_space<vmem>>, vector<2x128xf32>,
    } else {
    }
    %c0_i32_2 = arith.constant 0 : i32
    %7 = arith.cmpi eq, %arg0, %c0_i32_2 : i32
    %8 = arith.extui %7 : i1 to i32
    %c0_i32_3 = arith.constant 0 : i32
    %9 = arith.cmpi ne, %8, %c0_i32_3 : i32
    scf.if %9 {
      %c0 = arith.constant 0 : index
      %c0_6 = arith.constant 0 : index
      %16 = vector.load %arg2[%c0, %c0_6] : memref<16x300xf32, #tpu.memory_space<vmem>>, vector<16x300xf32>
      %17 = arith.truncf %16 : vector<16x300xf32> to vector<16x300xbf16>
      %c0_7 = arith.constant 0 : index
      %c0_8 = arith.constant 0 : index
      %18 = vector.load %arg3[%c0_7, %c0_8] : memref<300x128xbf16, #tpu.memory_space<vmem>>, vector<300x128xbf16>
      %cst = arith.constant dense<0.000000e+00> : vector<16x128xf32>
      %19 = tpu.matmul %17, %18, %cst {dimension_numbers = #tpu.dot_dimension_numbers<[1], [0], [0], [1], [0, 0, 1, 1], [], []>} : vector<16x300xbf16>, vector<300x128xbf16>, vector<16x128xf32> -> vector<16x128xf32>
      %c0_9 = arith.constant 0 : index
      %c0_10 = arith.constant 0 : index
      %20 = vector.load %arg6[%c0_9, %c0_10] : memref<8x128xf32, #tpu.memory_space<vmem>>, vector<1x128xf32>
      %21 = vector.broadcast %20 : vector<1x128xf32> to vector<16x128xf32>
      %22 = arith.addf %19, %21 : vector<16x128xf32>
      %c0_11 = arith.constant 0 : index
      %23 = memref.load %arg7[%c0_11] : memref<2xf32, #tpu.memory_space<smem>>
      %cst_12 = arith.constant 0.000000e+00 : f32
      %24 = vector.broadcast %cst_12 : f32 to vector<16x128xf32>
      %25 = arith.cmpf oge, %22, %24 : vector<16x128xf32>
      %26 = vector.broadcast %23 : f32 to vector<16x128xf32>
      %27 = arith.mulf %26, %22 : vector<16x128xf32>
      %28 = arith.select %25, %22, %27 : vector<16x128xi1>, vector<16x128xf32>
      %29 = arith.truncf %28 : vector<16x128xf32> to vector<16x128xbf16>
      %30 = arith.index_cast %1 : i32 to index
      %c0_13 = arith.constant 0 : index
      %31 = vector.load %arg9[%30, %c0_13] : memref<48x128xbf16, #tpu.memory_space<vmem>>, vector<16x128xbf16>
      tpu.vector_store %arg9[%30, %c0_13], %29 {strides = array<i32>} : memref<48x128xbf16, #tpu.memory_space<vmem>>, vector<16x128xbf16>,
      %cst_14 = arith.constant dense<0.000000e+00> : vector<128xf32>
      %32 = vector.multi_reduction <add>, %28, %cst_14 [0] : vector<16x128xf32> to vector<128xf32>
      %33 = vector.shape_cast %32 : vector<128xf32> to vector<1x128xf32>
      %34 = arith.mulf %28, %28 : vector<16x128xf32>
      %cst_15 = arith.constant dense<0.000000e+00> : vector<128xf32>
      %35 = vector.multi_reduction <add>, %34, %cst_15 [0] : vector<16x128xf32> to vector<128xf32>
      %36 = vector.shape_cast %35 : vector<128xf32> to vector<1x128xf32>
      %37 = tpu.concatenate %33, %36 in 0 : vector<1x128xf32>, vector<1x128xf32> -> vector<2x128xf32>
      %c0_16 = arith.constant 0 : index
      %c0_17 = arith.constant 0 : index
      %38 = vector.load %arg11[%c0_16, %c0_17] : memref<2x128xf32, #tpu.memory_space<vmem>>, vector<2x128xf32>
      %39 = arith.addf %38, %37 : vector<2x128xf32>
      %c0_18 = arith.constant 0 : index
      %c0_19 = arith.constant 0 : index
      %40 = vector.load %arg11[%c0_18, %c0_19] : memref<2x128xf32, #tpu.memory_space<vmem>>, vector<2x128xf32>
      tpu.vector_store %arg11[%c0_18, %c0_19], %39 {strides = array<i32>} : memref<2x128xf32, #tpu.memory_space<vmem>>, vector<2x128xf32>,
    } else {
    }
    %c1_i32 = arith.constant 1 : i32
    %10 = arith.cmpi eq, %arg0, %c1_i32 : i32
    %11 = arith.extui %10 : i1 to i32
    %c0_i32_4 = arith.constant 0 : i32
    %12 = arith.cmpi ne, %11, %c0_i32_4 : i32
    scf.if %12 {
      %16 = arith.index_cast %1 : i32 to index
      %c0 = arith.constant 0 : index
      %17 = vector.load %arg9[%16, %c0] : memref<48x128xbf16, #tpu.memory_space<vmem>>, vector<16x128xbf16>
      %18 = arith.extf %17 : vector<16x128xbf16> to vector<16x128xf32>
      %c1 = arith.constant 1 : index
      %c0_6 = arith.constant 0 : index
      %19 = vector.load %arg6[%c1, %c0_6] : memref<8x128xf32, #tpu.memory_space<vmem>>, vector<1x128xf32>
      %c2 = arith.constant 2 : index
      %c0_7 = arith.constant 0 : index
      %20 = vector.load %arg6[%c2, %c0_7] : memref<8x128xf32, #tpu.memory_space<vmem>>, vector<1x128xf32>
      %c0_8 = arith.constant 0 : index
      %c0_9 = arith.constant 0 : index
      %21 = vector.load %arg11[%c0_8, %c0_9] : memref<2x128xf32, #tpu.memory_space<vmem>>, vector<2x128xf32>
      %22 = vector.extract_strided_slice %21 {offsets = [0, 0], sizes = [1, 128], strides = [1, 1]} : vector<2x128xf32> to vector<1x128xf32>
      %cst = arith.constant 0.020833334 : f32
      %23 = vector.broadcast %cst : f32 to vector<1x128xf32>
      %24 = arith.mulf %22, %23 : vector<1x128xf32>
      %25 = vector.extract_strided_slice %21 {offsets = [1, 0], sizes = [1, 128], strides = [1, 1]} : vector<2x128xf32> to vector<1x128xf32>
      %cst_10 = arith.constant 0.020833334 : f32
      %26 = vector.broadcast %cst_10 : f32 to vector<1x128xf32>
      %27 = arith.mulf %25, %26 : vector<1x128xf32>
      %28 = arith.mulf %24, %24 : vector<1x128xf32>
      %29 = arith.subf %27, %28 : vector<1x128xf32>
      %cst_11 = arith.constant 0.000000e+00 : f32
      %30 = vector.broadcast %cst_11 : f32 to vector<1x128xf32>
      %31 = arith.maximumf %29, %30 : vector<1x128xf32>
      %32 = vector.broadcast %24 : vector<1x128xf32> to vector<16x128xf32>
      %33 = arith.subf %18, %32 : vector<16x128xf32>
      %cst_12 = arith.constant 9.99999974E-6 : f32
      %34 = vector.broadcast %cst_12 : f32 to vector<1x128xf32>
      %35 = arith.addf %31, %34 : vector<1x128xf32>
      %36 = math.rsqrt %35 : vector<1x128xf32>
      %37 = arith.mulf %36, %19 : vector<1x128xf32>
      %38 = vector.broadcast %37 : vector<1x128xf32> to vector<16x128xf32>
      %39 = arith.mulf %33, %38 : vector<16x128xf32>
      %40 = vector.broadcast %20 : vector<1x128xf32> to vector<16x128xf32>
      %41 = arith.addf %39, %40 : vector<16x128xf32>
      %42 = arith.truncf %41 : vector<16x128xf32> to vector<16x128xbf16>
      %c0_13 = arith.constant 0 : index
      %c0_14 = arith.constant 0 : index
      %43 = vector.load %arg4[%c0_13, %c0_14] : memref<128x128xbf16, #tpu.memory_space<vmem>>, vector<128x128xbf16>
      %cst_15 = arith.constant dense<0.000000e+00> : vector<16x128xf32>
      %44 = tpu.matmul %42, %43, %cst_15 {dimension_numbers = #tpu.dot_dimension_numbers<[1], [0], [0], [1], [0, 0, 1, 1], [], []>} : vector<16x128xbf16>, vector<128x128xbf16>, vector<16x128xf32> -> vector<16x128xf32>
      %c3 = arith.constant 3 : index
      %c0_16 = arith.constant 0 : index
      %45 = vector.load %arg6[%c3, %c0_16] : memref<8x128xf32, #tpu.memory_space<vmem>>, vector<1x128xf32>
      %46 = vector.broadcast %45 : vector<1x128xf32> to vector<16x128xf32>
      %47 = arith.addf %44, %46 : vector<16x128xf32>
      %c1_17 = arith.constant 1 : index
      %48 = memref.load %arg7[%c1_17] : memref<2xf32, #tpu.memory_space<smem>>
      %cst_18 = arith.constant 0.000000e+00 : f32
      %49 = vector.broadcast %cst_18 : f32 to vector<16x128xf32>
      %50 = arith.cmpf oge, %47, %49 : vector<16x128xf32>
      %51 = vector.broadcast %48 : f32 to vector<16x128xf32>
      %52 = arith.mulf %51, %47 : vector<16x128xf32>
      %53 = arith.select %50, %47, %52 : vector<16x128xi1>, vector<16x128xf32>
      %54 = arith.truncf %53 : vector<16x128xf32> to vector<16x128xbf16>
      %55 = arith.index_cast %1 : i32 to index
      %c0_19 = arith.constant 0 : index
      %56 = vector.load %arg10[%55, %c0_19] : memref<48x128xbf16, #tpu.memory_space<vmem>>, vector<16x128xbf16>
      tpu.vector_store %arg10[%55, %c0_19], %54 {strides = array<i32>} : memref<48x128xbf16, #tpu.memory_space<vmem>>, vector<16x128xbf16>,
      %cst_20 = arith.constant dense<0.000000e+00> : vector<128xf32>
      %57 = vector.multi_reduction <add>, %53, %cst_20 [0] : vector<16x128xf32> to vector<128xf32>
      %58 = vector.shape_cast %57 : vector<128xf32> to vector<1x128xf32>
      %59 = arith.mulf %53, %53 : vector<16x128xf32>
      %cst_21 = arith.constant dense<0.000000e+00> : vector<128xf32>
      %60 = vector.multi_reduction <add>, %59, %cst_21 [0] : vector<16x128xf32> to vector<128xf32>
      %61 = vector.shape_cast %60 : vector<128xf32> to vector<1x128xf32>
      %62 = tpu.concatenate %58, %61 in 0 : vector<1x128xf32>, vector<1x128xf32> -> vector<2x128xf32>
      %c0_22 = arith.constant 0 : index
      %c0_23 = arith.constant 0 : index
      %63 = vector.load %arg12[%c0_22, %c0_23] : memref<2x128xf32, #tpu.memory_space<vmem>>, vector<2x128xf32>
      %64 = arith.addf %63, %62 : vector<2x128xf32>
      %c0_24 = arith.constant 0 : index
      %c0_25 = arith.constant 0 : index
      %65 = vector.load %arg12[%c0_24, %c0_25] : memref<2x128xf32, #tpu.memory_space<vmem>>, vector<2x128xf32>
      tpu.vector_store %arg12[%c0_24, %c0_25], %64 {strides = array<i32>} : memref<2x128xf32, #tpu.memory_space<vmem>>, vector<2x128xf32>,
    } else {
    }
    %c2_i32 = arith.constant 2 : i32
    %13 = arith.cmpi eq, %arg0, %c2_i32 : i32
    %14 = arith.extui %13 : i1 to i32
    %c0_i32_5 = arith.constant 0 : i32
    %15 = arith.cmpi ne, %14, %c0_i32_5 : i32
    scf.if %15 {
      %16 = arith.index_cast %1 : i32 to index
      %c0 = arith.constant 0 : index
      %17 = vector.load %arg10[%16, %c0] : memref<48x128xbf16, #tpu.memory_space<vmem>>, vector<16x128xbf16>
      %18 = arith.extf %17 : vector<16x128xbf16> to vector<16x128xf32>
      %c4 = arith.constant 4 : index
      %c0_6 = arith.constant 0 : index
      %19 = vector.load %arg6[%c4, %c0_6] : memref<8x128xf32, #tpu.memory_space<vmem>>, vector<1x128xf32>
      %c5 = arith.constant 5 : index
      %c0_7 = arith.constant 0 : index
      %20 = vector.load %arg6[%c5, %c0_7] : memref<8x128xf32, #tpu.memory_space<vmem>>, vector<1x128xf32>
      %c0_8 = arith.constant 0 : index
      %c0_9 = arith.constant 0 : index
      %21 = vector.load %arg12[%c0_8, %c0_9] : memref<2x128xf32, #tpu.memory_space<vmem>>, vector<2x128xf32>
      %22 = vector.extract_strided_slice %21 {offsets = [0, 0], sizes = [1, 128], strides = [1, 1]} : vector<2x128xf32> to vector<1x128xf32>
      %cst = arith.constant 0.020833334 : f32
      %23 = vector.broadcast %cst : f32 to vector<1x128xf32>
      %24 = arith.mulf %22, %23 : vector<1x128xf32>
      %25 = vector.extract_strided_slice %21 {offsets = [1, 0], sizes = [1, 128], strides = [1, 1]} : vector<2x128xf32> to vector<1x128xf32>
      %cst_10 = arith.constant 0.020833334 : f32
      %26 = vector.broadcast %cst_10 : f32 to vector<1x128xf32>
      %27 = arith.mulf %25, %26 : vector<1x128xf32>
      %28 = arith.mulf %24, %24 : vector<1x128xf32>
      %29 = arith.subf %27, %28 : vector<1x128xf32>
      %cst_11 = arith.constant 0.000000e+00 : f32
      %30 = vector.broadcast %cst_11 : f32 to vector<1x128xf32>
      %31 = arith.maximumf %29, %30 : vector<1x128xf32>
      %32 = vector.broadcast %24 : vector<1x128xf32> to vector<16x128xf32>
      %33 = arith.subf %18, %32 : vector<16x128xf32>
      %cst_12 = arith.constant 9.99999974E-6 : f32
      %34 = vector.broadcast %cst_12 : f32 to vector<1x128xf32>
      %35 = arith.addf %31, %34 : vector<1x128xf32>
      %36 = math.rsqrt %35 : vector<1x128xf32>
      %37 = arith.mulf %36, %19 : vector<1x128xf32>
      %38 = vector.broadcast %37 : vector<1x128xf32> to vector<16x128xf32>
      %39 = arith.mulf %33, %38 : vector<16x128xf32>
      %40 = vector.broadcast %20 : vector<1x128xf32> to vector<16x128xf32>
      %41 = arith.addf %39, %40 : vector<16x128xf32>
      %42 = arith.truncf %41 : vector<16x128xf32> to vector<16x128xbf16>
      %c0_13 = arith.constant 0 : index
      %c0_14 = arith.constant 0 : index
      %43 = vector.load %arg5[%c0_13, %c0_14] : memref<128x128xbf16, #tpu.memory_space<vmem>>, vector<128x128xbf16>
      %cst_15 = arith.constant dense<0.000000e+00> : vector<16x128xf32>
      %44 = tpu.matmul %42, %43, %cst_15 {dimension_numbers = #tpu.dot_dimension_numbers<[1], [0], [0], [1], [0, 0, 1, 1], [], []>} : vector<16x128xbf16>, vector<128x128xbf16>, vector<16x128xf32> -> vector<16x128xf32>
      %c6 = arith.constant 6 : index
      %c0_16 = arith.constant 0 : index
      %45 = vector.load %arg6[%c6, %c0_16] : memref<8x128xf32, #tpu.memory_space<vmem>>, vector<1x128xf32>
      %46 = vector.broadcast %45 : vector<1x128xf32> to vector<16x128xf32>
      %47 = arith.addf %44, %46 : vector<16x128xf32>
      %c0_17 = arith.constant 0 : index
      %c0_18 = arith.constant 0 : index
      %48 = vector.load %arg8[%c0_17, %c0_18] : memref<16x128xf32, #tpu.memory_space<vmem>>, vector<16x128xf32>
      tpu.vector_store %arg8[%c0_17, %c0_18], %47 {strides = array<i32>} : memref<16x128xf32, #tpu.memory_space<vmem>>, vector<16x128xf32>,
    } else {
    }
    return
  }
  func.func @transform_0(%arg0: i32, %arg1: i32) -> (i32, i32) {
    %c0_i32 = arith.constant 0 : i32
    %0 = arith.cmpi eq, %arg0, %c0_i32 : i32
    %c2_i32 = arith.constant 2 : i32
    %1 = arith.select %0, %arg1, %c2_i32 : i32
    %c0_i32_0 = arith.constant 0 : i32
    %c0_i32_1 = arith.constant 0 : i32
    return %1, %c0_i32_0 : i32, i32
  }
  func.func @transform_1(%arg0: i32, %arg1: i32) -> (i32, i32) {
    %c0_i32 = arith.constant 0 : i32
    %c0_i32_0 = arith.constant 0 : i32
    %c0_i32_1 = arith.constant 0 : i32
    return %c0_i32, %c0_i32_0 : i32, i32
  }
  func.func @transform_2(%arg0: i32, %arg1: i32) -> (i32, i32) {
    %c0_i32 = arith.constant 0 : i32
    %c0_i32_0 = arith.constant 0 : i32
    %c0_i32_1 = arith.constant 0 : i32
    return %c0_i32, %c0_i32_0 : i32, i32
  }
  func.func @transform_3(%arg0: i32, %arg1: i32) -> (i32, i32) {
    %c0_i32 = arith.constant 0 : i32
    %c0_i32_0 = arith.constant 0 : i32
    %c0_i32_1 = arith.constant 0 : i32
    return %c0_i32, %c0_i32_0 : i32, i32
  }
  func.func @transform_4(%arg0: i32, %arg1: i32) -> (i32, i32) {
    %c0_i32 = arith.constant 0 : i32
    %c0_i32_0 = arith.constant 0 : i32
    %c0_i32_1 = arith.constant 0 : i32
    return %c0_i32, %c0_i32_0 : i32, i32
  }
  func.func @transform_5(%arg0: i32, %arg1: i32) -> i32 {
    %c0_i32 = arith.constant 0 : i32
    %c0_i32_0 = arith.constant 0 : i32
    return %c0_i32 : i32
  }
  func.func @transform_6(%arg0: i32, %arg1: i32) -> (i32, i32) {
    %c2_i32 = arith.constant 2 : i32
    %0 = arith.cmpi eq, %arg0, %c2_i32 : i32
    %c0_i32 = arith.constant 0 : i32
    %1 = arith.select %0, %arg1, %c0_i32 : i32
    %c0_i32_0 = arith.constant 0 : i32
    %c0_i32_1 = arith.constant 0 : i32
    return %1, %c0_i32_0 : i32, i32
  }
}

</mosaic_0001>

<bundles_post_ra>
// kernel: tpu_custom_call.1
= control target key start
LH: loop header
LB: loop body
LE: loop exit
PB: predicated region body
PF: predicated region fallthrough
CT: control target
= control target key end

     0   :  { %s2231_s0 = inlined_call_operand.hbm [shape: f32[48,300], index: 0, kind: input, shape index: {}]   ;;  %s2232_s1 = inlined_call_operand.hbm [shape: bf16[300,128], index: 1, kind: input, shape index: {}]   ;;  %s2233_s2 = inlined_call_operand.hbm [shape: bf16[128,128], index: 2, kind: input, shape index: {}]   ;;  %s2234_s3 = inlined_call_operand.hbm [shape: bf16[128,128], index: 3, kind: input, shape index: {}]   ;;  %s2235_s4 = inlined_call_operand.vmem [shape: f32[8,128], index: 4, kind: input, shape index: {}]   ;;  %s2236_s5 = inlined_call_operand.vmem [shape: f32[2], index: 5, kind: input, shape index: {}]   ;;  %s2237_s6 = inlined_call_operand.hbm [shape: f32[48,128], index: 6, kind: output, shape index: {}]  }
   0x1   :  { %2251 = sst [smem:[#allocation27_spill]] %s2232_s1 }
   0x2   :  { %2252 = sst [smem:[#allocation28_spill]] %s2233_s2 }
   0x3   :  { %2253 = sst [smem:[#allocation29_spill]] %s2234_s3 }
   0x4   :  { %2254 = sst [smem:[#allocation30_spill]] %s2235_s4 }
   0x5   :  { %2255 = sst [smem:[#allocation31_spill]] %s2237_s6 }
   0x6   :  { %11 = vsyncpa [#allocation7], 0 }
   0x7   :  { %13 = vsyncpa [#allocation7 + $0x1], 0 }
   0x8   :  { %14 = vsyncpa [#allocation11], 0 }
   0x9   :  { %15 = vsyncpa [#allocation14], 0 }
   0xa   :  { %16 = vsyncpa [#allocation9], 0 }
   0xb   :  { %17 = vsyncpa [#allocation8], 0 }
   0xc   :  { %19 = vsyncpa [#allocation8 + $0x1], 0  ;;  %s1840_s21 = smov 0   ;;  %s1842_s22 = smov 0  }
   0xd   :  { %s1844_s23 = smov 0   ;;  %s1846_s24 = smov 0  }
   0xe   :  { %s1848_s25 = smov 0   ;;  %s1850_s26 = smov 0  }
   0xf   :  { %s1852_s27 = smov 0   ;;  %s1854_s28 = smov 0  }
  0x10   :  { %s1856_s29 = smov 0   ;;  %s1858_s30 = smov 0  }
  0x11   :  { %s1860_s7 = smov 0  }
  0x12 LB: > { %2256 = sst [smem:[#allocation22_spill]] %s1744_s21  ;;  %s1156_s8 = sadd.s32 4294967295, %s1784_s7   ;;  %s1784_s7 = sphi %s1860_s7, %s25_s7   ;;  %s1780_s30 = sphi %s1858_s30, %s2301_s30   ;;  %s1776_s29 = sphi %s1856_s29, %s2300_s29   ;;  %s1772_s28 = sphi %s1854_s28, %s2299_s28   ;;  %s1768_s27 = sphi %s1852_s27, %s2298_s27   ;;  %s1764_s26 = sphi %s1850_s26, %s2297_s26   ;;  %s1760_s25 = sphi %s1848_s25, %s2296_s25   ;;  %s1756_s24 = sphi %s1846_s24, %s2295_s24   ;;  %s1752_s23 = sphi %s1844_s23, %s2294_s23   ;;  %s1748_s22 = sphi %s1842_s22, %s2293_s22   ;;  %s1744_s21 = sphi %s1840_s21, %s2292_s21  }
  0x13   : > { %2257 = sst [smem:[#allocation23_spill]] %s1768_s27  ;;  %s1157_s9 = sadd.s32 4294967294, %s1784_s7  }
  0x14   : > { %2258 = sst [smem:[#allocation24_spill]] %s1772_s28  ;;  %p61_p0 = scmp.ne.s32.totalorder %s1760_s25, %s1756_s24 }
  0x15   : > { %p1896_p1 = scmp.eq.s32.totalorder %s1156_s8, 0  ;;  %p193_p2 = scmp.ne.s32.totalorder %s1752_s23, %s1748_s22 }
  0x16   : > { %p194_p3 = scmp.eq.s32.totalorder %s1156_s8, 8  ;;  %p199_p5 = scmp.ne.s32.totalorder %s1748_s22, %s1744_s21 }
  0x17   : > { %s2259_s10 = scalar_select %p1896_p1, 1, 0 }
  0x18   : > { %p1904_p4 = por %p1896_p1, %p61_p0  ;;  %p1910_p6 = por %p194_p3, %p193_p2 }
  0x19   : > { %p200_p7 = scmp.eq.s32.totalorder %s1157_s9, 8  ;;  %p1158_p8 = scmp.ge.s32.totalorder %s1784_s7, 1 }
  0x1a   : > { %s2260_s11 = scalar_select %p1904_p4, 1, 0 }
  0x1b   : > { %s2261_s12 = scalar_select %p1910_p6, 1, 0 }
  0x1c   : > { %p207_p9 = scmp.lt.s32.totalorder %s1784_s7, 10  ;;  %p1916_p10 = por %p200_p7, %p199_p5 }
  0x1d   : > { %2262 = sst [smem:[#allocation25_spill]] %s2261_s12  ;;  %s1786_s15 = smov [#allocation10]  }
  0x1e   : > { %s2263_s13 = scalar_select %p1916_p10, 1, 0 }
  0x1f   : > { %p1920_p11 = pnand %p1158_p8, %p207_p9  ;;  %s219_s16 = sshll.u32 %s1786_s15, 4  ;;  %s220_s16 = int_to_ptr.vmem [resolvable:$true] %s219_s16 }
  0x20   : > { %2264 = sst [smem:[#allocation26_spill]] %s2263_s13  ;;  %s1787_s18 = smov [#allocation12]  }
  0x21   : > { %s2265_s14 = scalar_select %p1920_p11, 1, 0 }
  0x22   : > { %p1346_p12 = pneg %p1920_p11  ;;  %s232_s19 = sshll.u32 %s1787_s18, 4  ;;  %s1932_s19 = int_to_ptr.vmem [resolvable:$true] %s232_s19 }
  0x23   : > { %s2267_s1 = sld [smem:[#allocation27_spill]] }
  0x24   : > { %p1928_p13 = pnand %p1346_p12, %p1896_p1 }
  0x26   : > { %p1942_p2 = pneg %p1928_p13 }
  0x29   : > { %s1521_s8 = scalar_lea.hbm %s2267_s1, 2432 }
  0x2a   : > { %p1522_p0 = scmp.ne.s32.totalorder %s2267_s1, %s1521_s8  ;;  %p1528_p7 = scmp.lt.u32.totalorder %s1521_s8, %s2267_s1 }
  0x2c   : > { %p1524_p3 = pnand %p1942_p2, %p1522_p0 }
  0x2e   : > { %p1525_p5 = pneg %p1524_p3 }
  0x30   : > { %p1530_p8 = pnand %p1528_p7, %p1525_p5 }
  0x32   : > { %1533 = shalt.err (!%p1530_p8)
}
  0x33   : > { %s1534_s20 = scalar_lea.vmem %s220_s16, 2432  ;;  %p1542_p6 = scmp.lt.s32.totalorder %s220_s16, %s220_s16 }
  0x34   : > { %p1535_p9 = scmp.ne.s32.totalorder %s220_s16, %s1534_s20  ;;  %p1543_p1 = scmp.lt.s32.totalorder %s1534_s20, %s1534_s20 }
  0x36   : > { %p1537_p12 = pnand %p1535_p9, %p1942_p2  ;;  %p1544_p4 = por %p1543_p1, %p1542_p6 }
  0x38   : > { %p1538_p10 = pneg %p1537_p12 }
  0x3a   : > { %p1545_p11 = pnand %p1544_p4, %p1538_p10 }
  0x3c   : > { %1548 = shalt.err (!%p1545_p11)
}
  0x3d   : > { %s1788_s13 = smov 64   ;;  %s1789_s24 = smov 4  }
  0x3e   : > { %1349 = dma.hbm_to_vmem [thread:$0]  (!%p1928_p13), %s2267_s1, 2432, %s220_s16, [#allocation11], %s1788_s13, %s1788_s13, %s1789_s24  }
  0x3f   : > { %s2269_s2 = sld [smem:[#allocation28_spill]] }
  0x45   : > { %s1549_s6 = scalar_lea.hbm %s2269_s2, 1024 }
  0x46   : > { %p1550_p1 = scmp.ne.s32.totalorder %s2269_s2, %s1549_s6  ;;  %p1556_p10 = scmp.lt.u32.totalorder %s1549_s6, %s2269_s2 }
  0x48   : > { %p1552_p4 = pnand %p1550_p1, %p1942_p2 }
  0x4a   : > { %p1553_p6 = pneg %p1552_p4 }
  0x4c   : > { %p1558_p11 = pnand %p1556_p10, %p1553_p6 }
  0x4e   : > { %1561 = shalt.err (!%p1558_p11)
}
  0x4f   : > { %s1562_s16 = scalar_lea.vmem %s1932_s19, 1024  ;;  %p1570_p7 = scmp.lt.s32.totalorder %s1932_s19, %s1932_s19 }
  0x50   : > { %p1563_p0 = scmp.ne.s32.totalorder %s1932_s19, %s1562_s16  ;;  %p1571_p8 = scmp.lt.s32.totalorder %s1562_s16, %s1562_s16 }
  0x52   : > { %p1565_p3 = pnand %p1563_p0, %p1942_p2  ;;  %p1572_p9 = por %p1571_p8, %p1570_p7 }
  0x54   : > { %p1566_p5 = pneg %p1565_p3 }
  0x56   : > { %p1573_p12 = pnand %p1572_p9, %p1566_p5 }
  0x58   : > { %1576 = shalt.err (!%p1573_p12)
}
  0x59   : > { %1352 = dma.hbm_to_vmem [thread:$0]  (!%p1928_p13), %s2269_s2, 1024, %s1932_s19, [#allocation11], %s1788_s13, %s1788_s13, %s1789_s24  }
  0x5a   : > { %s1790_s28 = smov [#allocation13]   ;;  %s262_s9 = sshll.u32 %s2236_s5, 4  ;;  %s263_s9 = int_to_ptr.vmem [resolvable:$true] %s262_s9 }
  0x5b   : > { %s245_s12 = sshll.u32 %s1790_s28, 4  ;;  %s2270_s3 = sld [smem:[#allocation29_spill]]  ;;  %s246_s12 = int_to_ptr.vmem [resolvable:$true] %s245_s12 }
  0x61   : > { %s1577_s16 = scalar_lea.hbm %s2270_s3, 1024 }
  0x62   : > { %p1578_p1 = scmp.ne.s32.totalorder %s2270_s3, %s1577_s16  ;;  %p1584_p10 = scmp.lt.u32.totalorder %s1577_s16, %s2270_s3 }
  0x64   : > { %p1580_p4 = pnand %p1578_p1, %p1942_p2 }
  0x66   : > { %p1581_p6 = pneg %p1580_p4 }
  0x68   : > { %p1586_p11 = pnand %p1584_p10, %p1581_p6 }
  0x6a   : > { %1589 = shalt.err (!%p1586_p11)
}
  0x6b   : > { %s1590_s6 = scalar_lea.vmem %s246_s12, 1024  ;;  %p1598_p7 = scmp.lt.s32.totalorder %s246_s12, %s246_s12 }
  0x6c   : > { %p1591_p0 = scmp.ne.s32.totalorder %s246_s12, %s1590_s6  ;;  %p1599_p8 = scmp.lt.s32.totalorder %s1590_s6, %s1590_s6 }
  0x6e   : > { %p1593_p3 = pnand %p1591_p0, %p1942_p2  ;;  %p1600_p9 = por %p1599_p8, %p1598_p7 }
  0x70   : > { %p1594_p5 = pneg %p1593_p3 }
  0x72   : > { %p1601_p12 = pnand %p1600_p9, %p1594_p5 }
  0x74   : > { %1604 = shalt.err (!%p1601_p12)
}
  0x75   : > { %1355 = dma.hbm_to_vmem [thread:$0]  (!%p1928_p13), %s2270_s3, 1024, %s246_s12, [#allocation14], %s1788_s13, %s1788_s13, %s1789_s24  }
  0x76   : > { %s1605_s28 = scalar_lea.vmem %s263_s9, 16  ;;  %p1613_p10 = scmp.lt.s32.totalorder %s263_s9, %s263_s9 }
  0x77   : > { %p1606_p1 = scmp.ne.s32.totalorder %s263_s9, %s1605_s28  ;;  %p1614_p11 = scmp.lt.s32.totalorder %s1605_s28, %s1605_s28 }
  0x79   : > { %p1608_p4 = pnand %p1606_p1, %p1942_p2  ;;  %p1615_p0 = por %p1614_p11, %p1613_p10 }
  0x7b   : > { %p1609_p6 = pneg %p1608_p4 }
  0x7d   : > { %p1616_p3 = pnand %p1615_p0, %p1609_p6 }
  0x7f   : > { %1619 = shalt.err (!%p1616_p3)
}
  0x80   : > { %s1791_s21 = smov [#allocation15]   ;;  %s34_s15 = sadd.s32 1, %s1776_s29 }
  0x81   : > { %1358 = dma.vmem_to_smem (!%p1928_p13), %s263_s9, 16, %s1791_s21, [#allocation9]  }
  0x82   : > { %p35_p2 = scmp.ge.s32.totalorder %s34_s15, 3  ;;  %s37_s13 = sadd.s32 1, %s1780_s30 }
  0x83   : > { %p41_p5 = scmp.eq.s32.totalorder %s1780_s30, 0  ;;  %s48_s24 = sadd.s32 1, %s1764_s26 }
  0x84   : > { %s2303_s15 = smov (%p35_p2, %s34_s15), 0  ;;  %s2305_s13 = smov (!%p35_p2, %s37_s13), %s1780_s30 }
  0x85   : > { %s42_s17 = scalar_select %p41_p5, %s1776_s29, 2 }
  0x86   : > { %p39_p7 = scmp.ge.s32.totalorder %s2305_s13, 3  ;;  %p55_p8 = scmp.ne.s32.totalorder %s1764_s26, %s1760_s25 }
  0x87   : > { %p56_p9 = scmp.eq.s32.totalorder %s1784_s7, 0  ;;  %p176_p12 = scmp.eq.s32.totalorder %s1780_s30, 2 }
  0x88   : > { %s2307_s13 = smov (%p39_p7, %s2305_s13), 0  ;;  %s183_s8 = sadd.s32 1, %s1752_s23 }
  0x89   : > { %p2029_p13 = por %p56_p9, %p55_p8  ;;  %p43_p1 = scmp.eq.s32.totalorder %s2307_s13, 0 }
  0x8a   : > { %p178_p4 = scmp.eq.s32.totalorder %s2307_s13, 2  ;;  %p1371_p6 = scmp.lt.s32.totalorder %s1784_s7, 9 }
  0x8b   : > { %s177_s9 = scalar_select %p176_p12, %s1776_s29, 0 }
  0x8c   : > { %s44_s18 = scalar_select %p43_p1, %s2303_s15, 2 }
  0x8d   : > { %s179_s20 = scalar_select %p178_p4, %s2303_s15, 0 }
  0x8e   : > { %s45_s16 = ssub.s32 %s42_s17, %s44_s18  ;;  %s273_s4 = sand.u32 1, %s1764_s26  }
  0x8f   : > { %p46_p10 = scmp.eq.s32.totalorder %s45_s16, 0  ;;  %s180_s19 = ssub.s32 %s177_s9, %s179_s20 }
  0x90   : > { %p181_p11 = scmp.eq.s32.totalorder %s180_s19, 0  ;;  %s1323_s27 = smul.u32 48, %s273_s4 }
  0x91   : > { %s2042_s6 = scalar_select %p46_p10, %s1764_s26, %s48_s24  }
  0x92   : > { %s2045_s1 = scalar_select %p181_p11, %s1752_s23, %s183_s8  }
  0x93   : > { %s1324_s28 = smul.u32 768, %s42_s17  ;;  %p2049_p0 = pnand %p1371_p6, %p2029_p13 }
  0x94   : > { %s277_s24 = scalar_lea.vmem [#allocation6], %s1323_s27  ;;  %s2060_s17 = scalar_lea.sflag [#allocation7], %s273_s4 }
  0x95   : > { %s2056_s18 = scalar_lea.hbm %s2231_s0, %s1324_s28  ;;  %s287_s8 = sshll.u32 %s277_s24, 4  ;;  %s2058_s8 = int_to_ptr.vmem [resolvable:$true] %s287_s8 }
  0x96   : > { %s1620_s12 = scalar_lea.hbm %s2056_s18, 768  ;;  %p1622_p2 = pneg %p2049_p0 }
  0x97   : > { %p1621_p3 = scmp.ne.s32.totalorder %s2056_s18, %s1620_s12  ;;  %s1625_s9 = scalar_lea.hbm %s2231_s0, 2304 }
  0x98   : > { %p1626_p8 = scmp.lt.u32.totalorder %s2056_s18, %s2231_s0  ;;  %p1627_p9 = scmp.lt.u32.totalorder %s1625_s9, %s1620_s12 }
  0x99   : > { %p1623_p5 = pnand %p1622_p2, %p1621_p3  ;;  %p1629_p13 = scmp.lt.u32.totalorder %s1620_s12, %s2056_s18 }
  0x9a   : > { %p1628_p12 = por %p1627_p9, %p1626_p8 }
  0x9b   : > { %p1624_p7 = pneg %p1623_p5 }
  0x9c   : > { %p1630_p1 = por %p1629_p13, %p1628_p12 }
  0x9e   : > { %p1631_p4 = pnand %p1630_p1, %p1624_p7 }
  0xa0   : > { %1634 = shalt.err (!%p1631_p4)
}
  0xa1   : > { %s1635_s19 = scalar_lea.vmem %s2058_s8, 768  ;;  %s1792_s4 = smov [#allocation6]  }
  0xa2   : > { %p1636_p6 = scmp.ne.s32.totalorder %s2058_s8, %s1635_s19  ;;  %s1640_s27 = sshll.u32 %s1792_s4, 4  ;;  %s1641_s27 = int_to_ptr.vmem [resolvable:$false] %s1640_s27 }
  0xa3   : > { %s1642_s28 = scalar_lea.vmem %s1641_s27, 1536  ;;  %p1643_p3 = scmp.lt.s32.totalorder %s2058_s8, %s1641_s27 }
  0xa4   : > { %p1638_p10 = pnand %p1636_p6, %p1622_p2  ;;  %p1644_p5 = scmp.lt.s32.totalorder %s1642_s28, %s1635_s19 }
  0xa6   : > { %p1639_p11 = pneg %p1638_p10  ;;  %p1645_p8 = por %p1644_p5, %p1643_p3 }
  0xa8   : > { %p1646_p9 = pnand %p1645_p8, %p1639_p11 }
  0xaa   : > { %1649 = shalt.err (!%p1646_p9)
}
  0xab   : > { %s1793_s24 = smov 384   ;;  %s1794_s12 = smov 24  }
  0xac   : > { %1362 = dma.hbm_to_vmem [thread:$0]  (!%p2049_p0), %s2056_s18, 768, %s2058_s8, %s2060_s17, %s1793_s24, %s1793_s24, %s1794_s12  }
  0xad   : > { %p2273_p2 = scmp.ne.s32.totalorder %s2265_s14, 0 }
  0xae   : > { %s301_s2 = sand.u32 (!%p2273_p2), 1, %s1760_s25   ;;  %p2274_p7 = scmp.ne.s32.totalorder (!%p2273_p2), %s2260_s11, 0 }
  0xaf   : > { %299 = sbr.rel (%p2273_p2) target bundleno = 1063 (0x427), region = 44  ;;  %s302_s9 = scalar_lea.sflag (!%p2273_p2), [#allocation7], %s301_s2 }
  0xb0   : > { %s1325_s3 = smul.u32 (!%p2273_p2), 48, %s301_s2 }
  0xb2   : > { %s2091_s20 = scalar_lea.vmem (!%p2273_p2), [#allocation6], %s1325_s3 }
  0xb6   : > { %1723 = dma.done.wait (%p2274_p7), %s302_s9, 768  }
  0xb7   : > { %1725 = vsyncadd (%p2274_p7), %s302_s9, 4294966528  ;;  %p2275_p12 = scmp.ne.s32.totalorder %s2259_s10, 0 }
  0xb9   : > { %1727 = dma.done.wait (%p2275_p12), [#allocation11], 3456  }
  0xba   : > { %1729 = vsyncadd (%p2275_p12), [#allocation11], 4294963840 }
  0xbb   : > { %1731 = dma.done.wait (%p2275_p12), [#allocation14], 1024  }
  0xbc   : > { %1733 = vsyncadd (%p2275_p12), [#allocation14], 4294966272 }
  0xbd   : > { %1735 = dma.done.wait (%p2275_p12), [#allocation9], 16  }
  0xbe   : > { %1737 = vsyncadd (%p2275_p12), [#allocation9], 4294967280 }
  0xbf   : > { %326 = sfence }
  0xc0   : > { %s2276_s11 = sld [smem:[#allocation23_spill]]  ;;  %s2277_s14 = sld [smem:[#allocation24_spill]] }
  0xc1   : > { %s348_s21 = sand.u32 1, %s1748_s22  }
  0xc2   : > { %s1172_s8 = sshll.u32 %s348_s21, 4 }
  0xc3   : > { %s2117_s17 = scalar_lea.vmem [#allocation16], %s1172_s8 }
  0xc6   : > { %s2111_s18 = sshll.u32 %s2276_s11, 4  ;;  %p359_p0 = scmp.eq.s32.totalorder %s2277_s14, 0 }
  0xc7   : > { %p360_p13 = scmp.eq.s32.totalorder %s2276_s11, 0 }
  0xc9   : > { %p361_p1 = pnand %p360_p13, %p359_p0 }
  0xca   : > { %v1795_v0 = vmov (!%p361_p1), 0.0  }
  0xcb   : > { %364 = sbr.rel (%p361_p1) target bundleno = 210 (0xd2), region = 68  ;;  %365 = vst [vmem:[#allocation4] sm:$0x3] (!%p361_p1), %v1795_v0  ;;  %366 = vst [vmem:[#allocation5] sm:$0x3] (!%p361_p1), %v1795_v0 }
  0xd2 PF: > { %s2278_s10 = sld [smem:[#allocation24_spill]] }
  0xd8   : > { %p1174_p4 = scmp.ne.s32.totalorder %s2278_s10, 0 }
  0xd9   : > { %v1482_v1 = vld [vmem:[#allocation10 + $0x40] sm:$0xff] (!%p1174_p4)   ;;  %v1796_v3 = vmov (!%p1174_p4), 0.0   ;;  %v1484_v4 = vld [vmem:[#allocation10 + $0x48] sm:$0xff] (!%p1174_p4)   ;;  %vm1797_vm0 = vmmov (!%p1174_p4), 0   ;;  %v1486_v6 = vld [vmem:[#allocation10 + $0x50] sm:$0xff] (!%p1174_p4)   ;;  %vm539_vm1 = vcmask (!%p1174_p4), 1045504  }
  0xda   : > { %369 = sbr.rel (%p1174_p4) target bundleno = 494 (0x1ee), region = 72  ;;  %v1483_v2 = vld [vmem:[#allocation10] sm:$0xff] (!%p1174_p4)   ;;  %1273 = vmatprep.subr.bf16.mxu1 (!%p1174_p4), %v1796_v3  ;;  %1229 = vmatprep.subr.bf16.mxu0 (!%p1174_p4), %v1482_v1  ;;  %v1485_v5 = vld [vmem:[#allocation10 + $0x8] sm:$0xff] (!%p1174_p4)   ;;  %v1487_v7 = vld [vmem:[#allocation10 + $0x10] sm:$0xff] (!%p1174_p4)   ;;  %vm535_vm2 = vcmask (!%p1174_p4), 359424   ;;  %s625_s16 = sld [smem:[#allocation15]] (!%p1174_p4) }
  0xdb   : > { %1230 = vmatpush3.bf16.msra.mxu0 (!%p1174_p4), %v1483_v2  ;;  %1279 = vmatprep.mubr.msk.bf16.mxu1 (!%p1174_p4), %vm1797_vm0, %v1796_v3  ;;  %v1488_v8 = vld [vmem:[#allocation10 + $0x58] sm:$0xff] (!%p1174_p4)   ;;  %v1490_v10 = vld [vmem:[#allocation10 + $0x60] sm:$0xff] (!%p1174_p4)   ;;  %v1497_v13 = vld [vmem:[#allocation10 + $0x88] sm:$0xff] (!%p1174_p4)   ;;  %s2279_s27 = sld [smem:[#allocation30_spill]] (!%p1174_p4)  ;;  %s634_s28 = sshra.s32 (!%p1174_p4), %s2111_s18, 4  ;;  %vm655_vm5 = vcmask (!%p1174_p4), 1040384  }
  0xdc   : > { %1231 = vmatprep.subr.bf16.mxu0 (!%p1174_p4), %v1484_v4  ;;  %v1489_v9 = vld [vmem:[#allocation10 + $0x18] sm:$0xff] (!%p1174_p4)   ;;  %v1494_v11 = vld [vmem:[#allocation10 + $0x80] sm:$0xff] (!%p1174_p4)   ;;  %v1492_v14 = vld [vmem:[#allocation10 + $0x68] sm:$0xff] (!%p1174_p4)   ;;  %s1196_s24 = sshll.u32 (!%p1174_p4), %s634_s28, 3 }
  0xdd   : > { %v1491_v12 = vld [vmem:[#allocation10 + $0x20] sm:$0xff] (!%p1174_p4)   ;;  %1274 = vmatpush3.bf16.msra.mxu1 (!%p1174_p4), %v1494_v11  ;;  %v371_v15 = vld [vmem:[%s2091_s20 + $0x8] sm:$0xff] (!%p1174_p4)  ;;  %v1500_v19 = vld [vmem:[#allocation10 + $0x90] sm:$0x3f] (!%p1174_p4)   ;;  %s637_s12 = scalar_lea.vmem (!%p1174_p4), [#allocation2], %s1196_s24 }
  0xde   : > { %1275 = vmatprep.subr.bf16.mxu1 (!%p1174_p4), %v1796_v3  ;;  %v374_v16 = vld [vmem:[%s2091_s20 + $0x20] sm:$0xff] (!%p1174_p4)  ;;  %v1493_v17 = vld [vmem:[#allocation10 + $0x28] sm:$0xff] (!%p1174_p4)   ;;  %v372_v21 = vld [vmem:[%s2091_s20 + $0x10] sm:$0xff] (!%p1174_p4)  ;;  %v541_v23 = vsel (!%p1174_p4), %vm539_vm1, %v1500_v19, 0 }
  0xdf   : > { %1232 = vmatpush3.bf16.msra.mxu0 (!%p1174_p4), %v1485_v5  ;;  %v377_v18 = vpack.c.bf16 (!%p1174_p4), %v374_v16, %v371_v15  ;;  %v1495_v20 = vld [vmem:[#allocation10 + $0x70] sm:$0xff] (!%p1174_p4)   ;;  %v375_v22 = vld [vmem:[%s2091_s20 + $0x28] sm:$0xff] (!%p1174_p4)  ;;  %v373_v29 = vld [vmem:[%s2091_s20 + $0x18] sm:$0xff] (!%p1174_p4) }
  0xe0   : > { %1233 = vmatprep.subr.bf16.mxu0 (!%p1174_p4), %v1486_v6  ;;  %v378_v24 = vpack.c.bf16 (!%p1174_p4), %v375_v22, %v372_v21  ;;  %v1496_v25 = vld [vmem:[#allocation10 + $0x30] sm:$0xff] (!%p1174_p4)   ;;  %v1498_v26 = vld [vmem:[#allocation10 + $0x78] sm:$0xff] (!%p1174_p4)   ;;  %v628_v43 = vstv (!%p1174_p4), %s625_s16 }
  0xe1   : > { %1276 = vmatpush3.bf16.msra.mxu1 %v1497_v13  ;;  %575 = vmatprep.mubr.bf16.mxu0 %v377_v18  ;;  %v1499_v27 = vld [vmem:[#allocation10 + $0x38] sm:$0xff]   ;;  %v370_v28 = vld [vmem:[%s2091_s20] sm:$0xff]  ;;  %v1175_v37 = vld [vmem:[%s2279_s27] ss:$0 sm:$0xff] }
  0xe2   : > { %1277 = vmatprep.subr.bf16.mxu1 %v1796_v3  ;;  %v376_v30 = vpack.c.bf16 %v373_v29, %v370_v28  ;;  %v657_v4 = vld [vmem:[#allocation4] sm:$0x3] }
  0xe3   : > { %1234 = vmatpush3.bf16.msra.mxu0 %v1487_v7 }
  0xe4   : > { %1235 = vmatprep.subr.bf16.mxu0 %v1488_v8 }
  0xe5   : > { %1278 = vmatpush3.bf16.msra.mxu1 %v541_v23 }
  0xe7   : > { %1236 = vmatpush3.bf16.msra.mxu0 %v1489_v9 }
  0xe8   : > { %1237 = vmatprep.subr.bf16.mxu0 %v1490_v10  ;;  %1280 = vmatmul.mubr.msk.bf16.vlgmr.msra.gmra.mrb[0].mxu1 %vm535_vm2, %v378_v24 }
  0xeb   : > { %1238 = vmatpush3.bf16.msra.mxu0 %v1491_v12 }
  0xec   : > { %1239 = vmatprep.subr.bf16.mxu0 %v1492_v14 }
  0xef   : > { %1240 = vmatpush3.bf16.msra.mxu0 %v1493_v17 }
  0xf0   : > { %1241 = vmatprep.subr.bf16.mxu0 %v1495_v20 }
  0xf3   : > { %1242 = vmatpush3.bf16.msra.mxu0 %v1496_v25 }
  0xf4   : > { %1243 = vmatprep.subr.bf16.mxu0 %v1498_v26 }
  0xf7   : > { %1244 = vmatpush3.bf16.msra.mxu0 %v1499_v27 }
  0xfa   : > { %576 = vmatmul.mubr.bf16.vlgmr.msra.gmra.mrb[0].mxu0 %v376_v30 }
 0x1bb   : > { %v618_v31 = vpop.f32.mrb[0].mxu1 }
 0x1bc   : > { %v1281_v32 = vpop.f32.mrb[1].mxu1 }
 0x1bd   : > { %v621_v33 = vpop.f32.mrb[2].mxu1 }
 0x1be   : > { %v1282_v34 = vpop.f32.mrb[3].mxu1 }
 0x1cd   : > { %v1245_v35 = vpop.f32.mrb[0].mxu0 }
 0x1ce   : > { %v1246_v36 = vpop.f32.mrb[1].mxu0 }
 0x1cf   : > { %v1247_v38 = vadd.f32 %v1246_v36, %v1245_v35  ;;  %v1248_v39 = vpop.f32.mrb[2].mxu0 }
 0x1d0   : > { %v1249_v40 = vpop.f32.mrb[3].mxu0 }
 0x1d1   : > { %v578_v41 = vadd.f32 %v1247_v38, %v1175_v37  ;;  %v1250_v42 = vadd.f32 %v1249_v40, %v1248_v39 }
 0x1d3   : > { %v619_v44 = vadd.f32 %v618_v31, %v578_v41  ;;  %v581_v45 = vadd.f32 %v1250_v42, %v1175_v37 }
 0x1d5   : > { %vm626_vm3 = vcmp.ge.f32.partialorder %v619_v44, 0.0  ;;  %v629_v46 = vmul.f32 %v628_v43, %v619_v44  ;;  %v622_v47 = vadd.f32 %v621_v33, %v581_v45 }
 0x1d7   : > { %v631_v48 = vsel %vm626_vm3, %v619_v44, %v629_v46  ;;  %vm627_vm4 = vcmp.ge.f32.partialorder %v622_v47, 0.0  ;;  %v630_v49 = vmul.f32 %v628_v43, %v622_v47 }
 0x1d8   : > { %v646_v51 = vmul.f32 %v631_v48, %v631_v48 }
 0x1d9   : > { %v632_v50 = vsel %vm627_vm4, %v622_v47, %v630_v49 }
 0x1da   : > { %v633_v52 = vpack.c.bf16 %v632_v50, %v631_v48  ;;  %v639_v53 = vadd.f32 %v632_v50, %v631_v48  ;;  %v647_v54 = vmul.f32 %v632_v50, %v632_v50 }
 0x1dc   : > { %638 = vst [vmem:[%s637_s12] sm:$0xff] %v633_v52  ;;  %v640_v55 = vrot.slane %v639_v53, 4  ;;  %v648_v56 = vadd.f32 %v647_v54, %v646_v51 }
 0x1de   : > { %v641_v57 = vadd.f32 %v640_v55, %v639_v53  ;;  %v649_v58 = vrot.slane %v648_v56, 4 }
 0x1e0   : > { %v642_v59 = vrot.slane %v641_v57, 2  ;;  %v650_v60 = vadd.f32 %v649_v58, %v648_v56 }
 0x1e2   : > { %v643_v61 = vadd.f32 %v642_v59, %v641_v57  ;;  %v651_v62 = vrot.slane %v650_v60, 2 }
 0x1e4   : > { %v644_v63 = vrot.slane %v643_v61, 1  ;;  %v652_v0 = vadd.f32 %v651_v62, %v650_v60 }
 0x1e6   : > { %v653_v1 = vrot.slane %v652_v0, 1  ;;  %v645_v2 = vadd.f32 %v644_v63, %v643_v61 }
 0x1e8   : > { %v654_v3 = vadd.f32 %v653_v1, %v652_v0 }
 0x1ea   : > { %v656_v5 = vsel %vm655_vm5, %v645_v2, %v654_v3 }
 0x1eb   : > { %v658_v6 = vadd.f32 %v657_v4, %v656_v5 }
 0x1ed   : > { %659 = vst [vmem:[#allocation4] sm:$0x3] %v658_v6 }
 0x1ee PF: > { %s2280_s2 = sld [smem:[#allocation24_spill]] }
 0x1f4   : > { %p1197_p6 = scmp.ne.s32.totalorder %s2280_s2, 1 }
 0x1f5   : > { %v1501_v7 = vld [vmem:[#allocation12] sm:$0xff] (!%p1197_p6)   ;;  %v1798_v8 = vmov (!%p1197_p6), 0.0   ;;  %v1502_v9 = vld [vmem:[#allocation12 + $0x8] sm:$0xff] (!%p1197_p6)   ;;  %vm1799_vm6 = vmmov (!%p1197_p6), 0   ;;  %v1503_v10 = vld [vmem:[#allocation12 + $0x10] sm:$0xff] (!%p1197_p6)   ;;  %s664_s3 = sshra.s32 (!%p1197_p6), %s2111_s18, 4  ;;  %v681_v18 = vlaneseq (!%p1197_p6) }
 0x1f6   : > { %663 = sbr.rel (%p1197_p6) target bundleno = 775 (0x307), region = 76  ;;  %1283 = vmatprep.subr.bf16.mxu0 (!%p1197_p6), %v1798_v8  ;;  %1299 = vmatprep.mubr.msk.bf16.mxu0 (!%p1197_p6), %vm1799_vm6, %v1798_v8  ;;  %v673_v11 = vld [vmem:[#allocation4] sm:$0x3] (!%p1197_p6)  ;;  %v1504_v12 = vld [vmem:[#allocation12 + $0x18] sm:$0xff] (!%p1197_p6)   ;;  %v1506_v19 = vld [vmem:[#allocation12 + $0x28] sm:$0xff] (!%p1197_p6)   ;;  %s2132_s9 = sshll.u32 (!%p1197_p6), %s664_s3, 3 }
 0x1f7   : > { %1284 = vmatpush3.bf16.msra.mxu0 (!%p1197_p6), %v1501_v7  ;;  %v674_v13 = vmul.f32 (!%p1197_p6), 0.020833334, %v673_v11  ;;  %v1505_v15 = vld [vmem:[#allocation12 + $0x20] sm:$0xff] (!%p1197_p6)   ;;  %v682_v22 = vshrl.u32 (!%p1197_p6), %v681_v18, 7  ;;  %v1507_v23 = vld [vmem:[#allocation12 + $0x30] sm:$0xff] (!%p1197_p6)   ;;  %v1508_v25 = vld [vmem:[#allocation12 + $0x38] sm:$0xff] (!%p1197_p6)  }
 0x1f8   : > { %1285 = vmatprep.subr.bf16.mxu0 (!%p1197_p6), %v1798_v8  ;;  %s667_s20 = scalar_lea.vmem (!%p1197_p6), [#allocation2], %s2132_s9  ;;  %s2281_s8 = sld [smem:[#allocation30_spill]] (!%p1197_p6)  ;;  %vm844_vm9 = vcmask (!%p1197_p6), 1040384  }
 0x1f9   : > { %v675_v14 = vmul.f32 (!%p1197_p6), %v674_v13, %v674_v13  ;;  %v683_v24 = vsub.s32 (!%p1197_p6), 0, %v682_v22  ;;  %v668_v26 = vld [vmem:[%s667_s20] sm:$0xff] (!%p1197_p6)  ;;  %v695_v32 = vsub.s32 (!%p1197_p6), 1, %v682_v22  ;;  %s1209_s19 = sld [smem:[#allocation15 + $0x1]] (!%p1197_p6)  ;;  %s826_s28 = scalar_lea.vmem (!%p1197_p6), [#allocation3], %s2132_s9 }
 0x1fa   : > { %v669_v28 = vunpack.c.l.bf16 (!%p1197_p6), %v668_v26  ;;  %v670_v29 = vunpack.c.h.bf16 (!%p1197_p6), %v668_v26 }
 0x1fb   : > { %1286 = vmatpush3.bf16.msra.mxu0 (!%p1197_p6), %v1502_v9  ;;  %v677_v16 = vrot.slane (!%p1197_p6), %v675_v14, 7  ;;  %v684_v30 = vrot.slane (!%p1197_p6), %v674_v13, %v683_v24  ;;  %v846_v9 = vld [vmem:[#allocation5] sm:$0x3] (!%p1197_p6) }
 0x1fc   : > { %1287 = vmatprep.subr.bf16.mxu0 (!%p1197_p6), %v1798_v8 }
 0x1fd   : > { %v679_v17 = vsub.f32 %v674_v13, %v677_v16  ;;  %v685_v34 = vsub.f32 %v669_v28, %v684_v30  ;;  %v686_v35 = vsub.f32 %v670_v29, %v684_v30 }
 0x1fe   : > { %v671_v27 = vld [vmem:[%s2281_s8 + $0x1] sm:$0x1]  ;;  %v1199_v38 = vld [vmem:[%s2281_s8 + $0x2] ss:$0 sm:$0xff]  ;;  %v1200_v44 = vld [vmem:[%s2281_s8 + $0x3] ss:$0 sm:$0xff] }
 0x1ff   : > { %1288 = vmatpush3.bf16.msra.mxu0 %v1503_v10  ;;  %v680_v20 = vmax.f32 %v679_v17, 0.0  ;;  %v690_v31 = vrot.slane %v671_v27, 7  ;;  %v819_v46 = vstv %s1209_s19 }
 0x200   : > { %1289 = vmatprep.subr.bf16.mxu0 %v1798_v8 }
 0x201   : > { %v687_v21 = vadd.f32 1e-05, %v680_v20 }
 0x203   : > { %1290 = vmatpush3.bf16.msra.mxu0 %v1504_v12  ;;  %1509 = vrsqrt.f32 %v687_v21 }
 0x204   : > { %1291 = vmatprep.subr.bf16.mxu0 %v1798_v8 }
 0x207   : > { %1292 = vmatpush3.bf16.msra.mxu0 %v1505_v15 }
 0x208   : > { %1293 = vmatprep.subr.bf16.mxu0 %v1798_v8 }
 0x20b   : > { %1294 = vmatpush3.bf16.msra.mxu0 %v1506_v19 }
 0x20c   : > { %1295 = vmatprep.subr.bf16.mxu0 %v1798_v8 }
 0x20d   : > { %v1510_v33 = vpop.eup %1509 }
 0x20e   : > { %v692_v36 = vmul.f32 %v1510_v33, %v690_v31 }
 0x20f   : > { %1296 = vmatpush3.bf16.msra.mxu0 %v1507_v23 }
 0x210   : > { %1297 = vmatprep.subr.bf16.mxu0 %v1798_v8  ;;  %v696_v37 = vrot.slane %v692_v36, %v695_v32 }
 0x212   : > { %v697_v39 = vmul.f32 %v696_v37, %v685_v34  ;;  %v698_v40 = vmul.f32 %v696_v37, %v686_v35 }
 0x213   : > { %1298 = vmatpush3.bf16.msra.mxu0 %v1508_v25 }
 0x214   : > { %v703_v41 = vadd.f32 %v1199_v38, %v697_v39  ;;  %v704_v42 = vadd.f32 %v1199_v38, %v698_v40 }
 0x216   : > { %v705_v43 = vpack.c.bf16 %v704_v42, %v703_v41 }
 0x218   : > { %1300 = vmatmul.mubr.bf16.vlgmr.msra.gmra.mrb[0].mxu0 %v705_v43 }
 0x2eb   : > { %v809_v45 = vpop.f32.mrb[0].mxu0 }
 0x2ec   : > { %v810_v47 = vadd.f32 %v1200_v44, %v809_v45  ;;  %v1301_v48 = vpop.f32.mrb[1].mxu0 }
 0x2ed   : > { %v812_v49 = vpop.f32.mrb[2].mxu0 }
 0x2ee   : > { %vm817_vm7 = vcmp.ge.f32.partialorder %v810_v47, 0.0  ;;  %v820_v50 = vmul.f32 %v819_v46, %v810_v47  ;;  %v813_v51 = vadd.f32 %v1200_v44, %v812_v49  ;;  %v1302_v52 = vpop.f32.mrb[3].mxu0 }
 0x2f0   : > { %v822_v53 = vsel %vm817_vm7, %v810_v47, %v820_v50  ;;  %vm818_vm8 = vcmp.ge.f32.partialorder %v813_v51, 0.0  ;;  %v821_v54 = vmul.f32 %v819_v46, %v813_v51 }
 0x2f1   : > { %v835_v56 = vmul.f32 %v822_v53, %v822_v53 }
 0x2f2   : > { %v823_v55 = vsel %vm818_vm8, %v813_v51, %v821_v54 }
 0x2f3   : > { %v824_v57 = vpack.c.bf16 %v823_v55, %v822_v53  ;;  %v828_v58 = vadd.f32 %v823_v55, %v822_v53  ;;  %v836_v59 = vmul.f32 %v823_v55, %v823_v55 }
 0x2f5   : > { %827 = vst [vmem:[%s826_s28] sm:$0xff] %v824_v57  ;;  %v829_v60 = vrot.slane %v828_v58, 4  ;;  %v837_v61 = vadd.f32 %v836_v59, %v835_v56 }
 0x2f7   : > { %v830_v62 = vadd.f32 %v829_v60, %v828_v58  ;;  %v838_v63 = vrot.slane %v837_v61, 4 }
 0x2f9   : > { %v831_v0 = vrot.slane %v830_v62, 2  ;;  %v839_v1 = vadd.f32 %v838_v63, %v837_v61 }
 0x2fb   : > { %v832_v2 = vadd.f32 %v831_v0, %v830_v62  ;;  %v840_v3 = vrot.slane %v839_v1, 2 }
 0x2fd   : > { %v833_v4 = vrot.slane %v832_v2, 1  ;;  %v841_v5 = vadd.f32 %v840_v3, %v839_v1 }
 0x2ff   : > { %v842_v6 = vrot.slane %v841_v5, 1  ;;  %v834_v7 = vadd.f32 %v833_v4, %v832_v2 }
 0x301   : > { %v843_v8 = vadd.f32 %v842_v6, %v841_v5 }
 0x303   : > { %v845_v10 = vsel %vm844_vm9, %v834_v7, %v843_v8 }
 0x304   : > { %v847_v11 = vadd.f32 %v846_v9, %v845_v10 }
 0x306   : > { %848 = vst [vmem:[#allocation5] sm:$0x3] %v847_v11 }
 0x307 PF: > { %s2282_s24 = sld [smem:[#allocation24_spill]] }
 0x30d   : > { %p1211_p10 = scmp.ne.s32.totalorder %s2282_s24, 2 }
 0x30e   : > { %v1511_v12 = vld [vmem:[#allocation13] sm:$0xff] (!%p1211_p10)   ;;  %v1800_v13 = vmov (!%p1211_p10), 0.0   ;;  %v1512_v14 = vld [vmem:[#allocation13 + $0x8] sm:$0xff] (!%p1211_p10)   ;;  %vm1801_vm10 = vmmov (!%p1211_p10), 0   ;;  %v1513_v15 = vld [vmem:[#allocation13 + $0x10] sm:$0xff] (!%p1211_p10)   ;;  %s853_s12 = sshra.s32 (!%p1211_p10), %s2111_s18, 4  ;;  %v870_v23 = vlaneseq (!%p1211_p10) }
 0x30f   : > { %852 = sbr.rel (%p1211_p10) target bundleno = 1034 (0x40a), region = 80  ;;  %1303 = vmatprep.subr.bf16.mxu0 (!%p1211_p10), %v1800_v13  ;;  %1319 = vmatprep.mubr.msk.bf16.mxu0 (!%p1211_p10), %vm1801_vm10, %v1800_v13  ;;  %v862_v16 = vld [vmem:[#allocation5] sm:$0x3] (!%p1211_p10)  ;;  %v1514_v17 = vld [vmem:[#allocation13 + $0x18] sm:$0xff] (!%p1211_p10)   ;;  %v1516_v24 = vld [vmem:[#allocation13 + $0x28] sm:$0xff] (!%p1211_p10)   ;;  %s1212_s2 = sshll.u32 (!%p1211_p10), %s853_s12, 3 }
 0x310   : > { %1304 = vmatpush3.bf16.msra.mxu0 (!%p1211_p10), %v1511_v12  ;;  %v863_v18 = vmul.f32 (!%p1211_p10), 0.020833334, %v862_v16  ;;  %v1515_v20 = vld [vmem:[#allocation13 + $0x20] sm:$0xff] (!%p1211_p10)   ;;  %v871_v27 = vshrl.u32 (!%p1211_p10), %v870_v23, 7  ;;  %v1517_v28 = vld [vmem:[#allocation13 + $0x30] sm:$0xff] (!%p1211_p10)   ;;  %v1518_v30 = vld [vmem:[#allocation13 + $0x38] sm:$0xff] (!%p1211_p10)  }
 0x311   : > { %1305 = vmatprep.subr.bf16.mxu0 (!%p1211_p10), %v1800_v13  ;;  %s856_s3 = scalar_lea.vmem (!%p1211_p10), [#allocation3], %s1212_s2  ;;  %s2283_s18 = sld [smem:[#allocation30_spill]] (!%p1211_p10) }
 0x312   : > { %v864_v19 = vmul.f32 (!%p1211_p10), %v863_v18, %v863_v18  ;;  %v872_v29 = vsub.s32 (!%p1211_p10), 0, %v871_v27  ;;  %v857_v31 = vld [vmem:[%s856_s3] sm:$0xff] (!%p1211_p10)  ;;  %v884_v37 = vsub.s32 (!%p1211_p10), 1, %v871_v27 }
 0x313   : > { %v858_v33 = vunpack.c.l.bf16 (!%p1211_p10), %v857_v31  ;;  %v859_v34 = vunpack.c.h.bf16 (!%p1211_p10), %v857_v31 }
 0x314   : > { %1306 = vmatpush3.bf16.msra.mxu0 (!%p1211_p10), %v1512_v14  ;;  %v866_v21 = vrot.slane (!%p1211_p10), %v864_v19, 7  ;;  %v873_v35 = vrot.slane (!%p1211_p10), %v863_v18, %v872_v29 }
 0x315   : > { %1307 = vmatprep.subr.bf16.mxu0 (!%p1211_p10), %v1800_v13 }
 0x316   : > { %v868_v22 = vsub.f32 %v863_v18, %v866_v21  ;;  %v874_v39 = vsub.f32 %v858_v33, %v873_v35  ;;  %v875_v40 = vsub.f32 %v859_v34, %v873_v35 }
 0x317   : > { %v860_v32 = vld [vmem:[%s2283_s18 + $0x4] sm:$0x1]  ;;  %v1213_v43 = vld [vmem:[%s2283_s18 + $0x5] ss:$0 sm:$0xff]  ;;  %v1214_v49 = vld [vmem:[%s2283_s18 + $0x6] ss:$0 sm:$0xff] }
 0x318   : > { %1308 = vmatpush3.bf16.msra.mxu0 %v1513_v15  ;;  %v869_v25 = vmax.f32 %v868_v22, 0.0  ;;  %v879_v36 = vrot.slane %v860_v32, 7 }
 0x319   : > { %1309 = vmatprep.subr.bf16.mxu0 %v1800_v13 }
 0x31a   : > { %v876_v26 = vadd.f32 1e-05, %v869_v25 }
 0x31c   : > { %1310 = vmatpush3.bf16.msra.mxu0 %v1514_v17  ;;  %1519 = vrsqrt.f32 %v876_v26 }
 0x31d   : > { %1311 = vmatprep.subr.bf16.mxu0 %v1800_v13 }
 0x320   : > { %1312 = vmatpush3.bf16.msra.mxu0 %v1515_v20 }
 0x321   : > { %1313 = vmatprep.subr.bf16.mxu0 %v1800_v13 }
 0x324   : > { %1314 = vmatpush3.bf16.msra.mxu0 %v1516_v24 }
 0x325   : > { %1315 = vmatprep.subr.bf16.mxu0 %v1800_v13 }
 0x326   : > { %v1520_v38 = vpop.eup %1519 }
 0x327   : > { %v881_v41 = vmul.f32 %v1520_v38, %v879_v36 }
 0x328   : > { %1316 = vmatpush3.bf16.msra.mxu0 %v1517_v28 }
 0x329   : > { %1317 = vmatprep.subr.bf16.mxu0 %v1800_v13  ;;  %v885_v42 = vrot.slane %v881_v41, %v884_v37 }
 0x32b   : > { %v886_v44 = vmul.f32 %v885_v42, %v874_v39  ;;  %v887_v45 = vmul.f32 %v885_v42, %v875_v40 }
 0x32c   : > { %1318 = vmatpush3.bf16.msra.mxu0 %v1518_v30 }
 0x32d   : > { %v892_v46 = vadd.f32 %v1213_v43, %v886_v44  ;;  %v893_v47 = vadd.f32 %v1213_v43, %v887_v45 }
 0x32f   : > { %v894_v48 = vpack.c.bf16 %v893_v47, %v892_v46 }
 0x331   : > { %1320 = vmatmul.mubr.bf16.vlgmr.msra.gmra.mrb[0].mxu0 %v894_v48 }
 0x404   : > { %v998_v50 = vpop.f32.mrb[0].mxu0 }
 0x405   : > { %v999_v51 = vadd.f32 %v1214_v49, %v998_v50  ;;  %v1321_v52 = vpop.f32.mrb[1].mxu0 }
 0x406   : > { %v1001_v53 = vpop.f32.mrb[2].mxu0 }
 0x407   : > { %1005 = vst [vmem:[%s2117_s17] sm:$0xff] %v999_v51  ;;  %v1002_v54 = vadd.f32 %v1214_v49, %v1001_v53  ;;  %v1322_v55 = vpop.f32.mrb[3].mxu0 }
 0x409   : > { %1006 = vst [vmem:[%s2117_s17 + $0x8] sm:$0xff] %v1002_v54 }
 0x40a PF: > { %s2284_s16 = sld [smem:[#allocation24_spill]]  ;;  %s2285_s19 = sld [smem:[#allocation23_spill]] }
 0x40b   : > { %s2286_s4 = sld [smem:[#allocation25_spill]]  ;;  %s1023_s27 = sshll.u32 %s2117_s17, 4  ;;  %s2161_s27 = int_to_ptr.vmem [resolvable:$true] %s1023_s27 }
 0x40c   : > { %s2287_s2 = sld [smem:[#allocation31_spill]]  ;;  %s2170_s9 = scalar_lea.sflag [#allocation8], %s348_s21 }
 0x40d   : > { %s1650_s20 = scalar_lea.vmem %s2161_s27, 256  ;;  %s1802_s17 = smov [#allocation16]  }
 0x40e   : > { %p1651_p3 = scmp.ne.s32.totalorder %s2161_s27, %s1650_s20  ;;  %s1654_s18 = sshll.u32 %s1802_s17, 4  ;;  %s1655_s18 = int_to_ptr.vmem [resolvable:$false] %s1654_s18 }
 0x40f   : > { %s1656_s11 = scalar_lea.vmem %s1655_s18, 512  ;;  %p1657_p2 = scmp.lt.s32.totalorder %s2161_s27, %s1655_s18 }
 0x410   : > { %p1015_p11 = scmp.eq.s32.totalorder %s2284_s16, 2  ;;  %p1658_p7 = scmp.lt.s32.totalorder %s1656_s11, %s1650_s20 }
 0x411   : > { %p2288_p5 = scmp.ne.s32.totalorder %s2286_s4, 0 }
 0x412   : > { %s2309_s19 = smov (!%p1015_p11, %s2285_s19), 0  ;;  %p1659_p12 = por %p1658_p7, %p1657_p2 }
 0x413   : > { %s1228_s28 = sshll.u32 %s2309_s19, 8  ;;  %p1652_p8 = pnand %p1651_p3, %p2288_p5 }
 0x414   : > { %s2166_s3 = scalar_lea.hbm %s2287_s2, %s1228_s28 }
 0x415   : > { %p1653_p9 = pneg %p1652_p8 }
 0x417   : > { %p1660_p0 = pnand %p1659_p12, %p1653_p9 }
 0x419   : > { %1663 = shalt.err (!%p1660_p0)
}
 0x41a   : > { %s1664_s21 = scalar_lea.hbm %s2166_s3, 256  ;;  %s1668_s10 = scalar_lea.hbm %s2287_s2, 768 }
 0x41b   : > { %p1665_p13 = scmp.ne.s32.totalorder %s2166_s3, %s1664_s21  ;;  %p1669_p6 = scmp.lt.u32.totalorder %s2166_s3, %s2287_s2 }
 0x41c   : > { %p1670_p10 = scmp.lt.u32.totalorder %s1668_s10, %s1664_s21  ;;  %p1672_p3 = scmp.lt.u32.totalorder %s1664_s21, %s2166_s3 }
 0x41d   : > { %p1666_p1 = pnand %p1665_p13, %p2288_p5 }
 0x41e   : > { %p1671_p11 = por %p1670_p10, %p1669_p6 }
 0x41f   : > { %p1667_p4 = pneg %p1666_p1 }
 0x420   : > { %p1673_p8 = por %p1672_p3, %p1671_p11 }
 0x422   : > { %p1674_p9 = pnand %p1673_p8, %p1667_p4 }
 0x424   : > { %1677 = shalt.err (!%p1674_p9)
}
 0x425   : > { %s1803_s28 = smov 128   ;;  %s1804_s24 = smov 8  }
 0x426   : > { %1344 = dma.vmem_to_hbm [thread:$0]  (%p2288_p5), %s2161_s27, 256, %s2166_s3, %s2170_s9, %s1803_s28, %s1803_s28, %s1804_s24  }
 0x427 PF: > { %s2289_s12 = sld [smem:[#allocation22_spill]]  ;;  %s2290_s20 = sld [smem:[#allocation26_spill]] }
 0x428   : > { %p1376_p2 = scmp.ge.s32.totalorder %s1784_s7, 2 }
 0x42d   : > { %s1038_s17 = sand.u32 1, %s2289_s12   ;;  %p2291_p7 = scmp.ne.s32.totalorder %s2290_s20, 0 }
 0x42e   : > { %s1039_s18 = scalar_lea.sflag [#allocation8], %s1038_s17 }
 0x42f   : > { %p1364_p12 = pnand %p1376_p2, %p2291_p7 }
 0x431   : > { %1739 = dma.done.wait (!%p1364_p12), %s1039_s18, 256  }
 0x432   : > { %1741 = vsyncadd (!%p1364_p12), %s1039_s18, 4294967040  ;;  %s25_s7 = sadd.s32 1, %s1784_s7   ;;  %s2292_s21 = smov %s1748_s22 }
 0x433   : > { %p22_p0 = scmp.ge.s32.totalorder %s25_s7, 11   ;;  %s2293_s22 = smov %s1752_s23 }
 0x434   : > { %s2294_s23 = smov %s2045_s1  ;;  %s2295_s24 = smov %s1760_s25 }
 0x435   : > { %s2296_s25 = smov %s1764_s26  ;;  %s2297_s26 = smov %s2042_s6 }
 0x436   : > { %s2298_s27 = smov %s1776_s29  ;;  %s2299_s28 = smov %s1780_s30 }
 0x437   : > { %s2300_s29 = smov %s2303_s15  ;;  %s2301_s30 = smov %s2307_s13 }
 0x438   :  { %24 = sbr.rel (!%p22_p0) target bundleno = 18 (0x12), region = 126 }
 0x43f   :  { %1044 = vsyncpa [#allocation7], 1 }
 0x440   :  { %1046 = vsyncpa [#allocation7 + $0x1], 1 }
 0x441   :  { %1047 = vsyncpa [#allocation11], 1 }
 0x442   :  { %1048 = vsyncpa [#allocation14], 1 }
 0x443   :  { %1049 = vsyncpa [#allocation8], 1 }
 0x444   :  { %1051 = vsyncpa [#allocation8 + $0x1], 1 }
 0x445   :  { %1052 = vsyncpa [#allocation9], 1 }
 0x446   :  { %1054 = vsyncpa [#allocation9 + $0x1], 1 }

</bundles_post_ra>
